<compile_context>
chip_gen: v6e
topology: v6e:2x2x1
jax: 0.10.0
libtpu: 0.0.40
codegen_flags: <defaults>
</compile_context>

<pallas_src>
import jax
import jax.numpy as jnp
from jax.experimental import pallas as pl
from jax.experimental.pallas import tpu as pltpu

LANE = 128     # lane padding target for every feature-like dimension
K_CHEB = 5     # Chebyshev order of both ChebConv layers


# ----------------------------------------------------------------------------- kernel

def _cheb_forward_kernel(l_ref, x_ref, p_ref, w_ref, b_ref, out_ref, basis_ref):
    """Fused forward: ChebConv(K=5)+ReLU, ChebConv(K=5)+ReLU, add-pool, Linear+ReLU, Linear.

    l_ref     : (N_pad, N_pad)  scaled Laplacian, L~[dst, src]
    x_ref     : (N_pad, 128)    node features, lane-padded
    p_ref     : (G_pad, N_pad)  pooling matrix (P[g, i] = 1 iff batch[i] == g)
    w_ref     : (1536, 128)     packed weights: [cheb1 K*128 | cheb2 K*128 | lin1 128 | lin2 128]
    b_ref     : (4, 128)        packed biases: rows = cheb1, cheb2, lin1, lin2
    out_ref   : (G_pad, 128)    lane-dense output (sliced to (G, num_classes) outside)
    basis_ref : (N_pad, K*128)  VMEM scratch holding the Chebyshev basis [T_0 x | ... | T_4 x]
    """
    L = l_ref[...]                                      # (N_pad, N_pad)

    def cheb_layer(x_in, w_row_off, b_row):
        # Chebyshev recurrence; each T_k lands in a 128-lane-aligned column block of
        # the scratch so the K weight matmuls collapse into a single MXU matmul.
        tx0 = x_in
        basis_ref[:, 0:LANE] = tx0
        tx1 = jnp.dot(L, tx0, preferred_element_type=jnp.float32)
        basis_ref[:, LANE:2 * LANE] = tx1
        for k in range(2, K_CHEB):
            tx2 = 2.0 * jnp.dot(L, tx1, preferred_element_type=jnp.float32) - tx0
            basis_ref[:, k * LANE:(k + 1) * LANE] = tx2
            tx0, tx1 = tx1, tx2
        w_cat = w_ref[w_row_off:w_row_off + K_CHEB * LANE, :]          # (K*128, 128)
        h = jnp.dot(basis_ref[...], w_cat, preferred_element_type=jnp.float32)
        return jnp.maximum(h + b_ref[b_row:b_row + 1, :], 0.0)

    # ---- embedding: two ChebConv + ReLU layers ----
    h1 = cheb_layer(x_ref[...], 0, 0)                   # (N_pad, 128)
    h2 = cheb_layer(h1, K_CHEB * LANE, 1)               # (N_pad, 128)

    # ---- global_add_pool via one-hot pooling matrix (exact for aggr='sum') ----
    pooled = jnp.dot(p_ref[...], h2, preferred_element_type=jnp.float32)   # (G_pad, 128)

    # ---- MLP head ----
    off_l1 = 2 * K_CHEB * LANE
    off_l2 = off_l1 + LANE
    y = jnp.maximum(
        jnp.dot(pooled, w_ref[off_l1:off_l1 + LANE, :],
                preferred_element_type=jnp.float32) + b_ref[2:3, :], 0.0)
    out = jnp.dot(y, w_ref[off_l2:off_l2 + LANE, :],
                  preferred_element_type=jnp.float32) + b_ref[3:4, :]
    out_ref[...] = out.astype(out_ref.dtype)


# ----------------------------------------------------------------------------- wrapper glue

def _build_scaled_laplacian(n, edge_index, edge_weights):
    """Dense L~ matching PyG ChebConv defaults (sym normalization, lambda_max=2.0).

    L~[dst, src] = -deg^{-1/2}[src] * w * deg^{-1/2}[dst]; self-loops removed; diag = 0.
    """
    src = edge_index[0]
    dst = edge_index[1]
    if edge_weights is None:
        w = jnp.ones(src.shape, jnp.float32)
    else:
        w = edge_weights.astype(jnp.float32)
    w = jnp.where(src == dst, 0.0, w)                      # remove_self_loops
    deg = jnp.zeros((n,), jnp.float32).at[src].add(w)      # scatter on row (PyG get_laplacian)
    deg_safe = jnp.where(deg > 0, deg, 1.0)
    dis = jnp.where(deg > 0, 1.0 / jnp.sqrt(deg_safe), 0.0)
    norm = dis[src] * w * dis[dst]
    return jnp.zeros((n, n), jnp.float32).at[dst, src].add(-norm)


def _pad_to(a, rows, cols):
    return jnp.zeros((rows, cols), a.dtype).at[:a.shape[0], :a.shape[1]].set(a)


def _pack_params(params):
    """Pack all weights into one (1536, 128) slab and all biases into one (4, 128) slab."""
    wpack = jnp.zeros((2 * K_CHEB * LANE + 2 * LANE, LANE), jnp.float32)
    for k in range(K_CHEB):
        w1k = params["w1"][k]
        w2k = params["w2"][k]
        wpack = wpack.at[k * LANE:k * LANE + w1k.shape[0], :w1k.shape[1]].set(w1k)
        off2 = K_CHEB * LANE
        wpack = wpack.at[off2 + k * LANE:off2 + k * LANE + w2k.shape[0], :w2k.shape[1]].set(w2k)
    off_l1 = 2 * K_CHEB * LANE
    off_l2 = off_l1 + LANE
    wl1, wl2 = params["wl1"], params["wl2"]
    wpack = wpack.at[off_l1:off_l1 + wl1.shape[0], :wl1.shape[1]].set(wl1)
    wpack = wpack.at[off_l2:off_l2 + wl2.shape[0], :wl2.shape[1]].set(wl2)

    bpack = jnp.zeros((4, LANE), jnp.float32)
    bpack = bpack.at[0, :params["b1"].shape[0]].set(params["b1"])
    bpack = bpack.at[1, :params["b2"].shape[0]].set(params["b2"])
    bpack = bpack.at[2, :params["bl1"].shape[0]].set(params["bl1"])
    bpack = bpack.at[3, :params["bl2"].shape[0]].set(params["bl2"])
    return wpack, bpack


def cheb_forward(x, edge_index, params, batch=None, edge_weights=None, num_graphs=None):
    """x: (N, num_features) float; edge_index: (2, E) int32 [src; dst]."""
    n = x.shape[0]
    if batch is None:
        batch = jnp.zeros((n,), jnp.int32)
        num_graphs = 1
    elif num_graphs is None:
        num_graphs = int(batch.max()) + 1

    n_pad = ((n + 7) // 8) * 8
    g_pad = max(8, ((num_graphs + 7) // 8) * 8)

    l_tilde = _build_scaled_laplacian(n, edge_index, edge_weights)
    l_pad = _pad_to(l_tilde, n_pad, n_pad)
    x_pad = _pad_to(x.astype(jnp.float32), n_pad, LANE)
    pool = (batch[None, :] == jnp.arange(num_graphs, dtype=batch.dtype)[:, None])
    p_pad = _pad_to(pool.astype(jnp.float32), g_pad, n_pad)

    wpack, bpack = _pack_params(params)
    num_classes = params["wl2"].shape[1]

    vmem = pl.BlockSpec(memory_space=pltpu.MemorySpace.VMEM)
    fn = pl.pallas_call(
        _cheb_forward_kernel,
        out_shape=jax.ShapeDtypeStruct((g_pad, LANE), jnp.float32),
        in_specs=[vmem] * 5,
        out_specs=vmem,
        scratch_shapes=[pltpu.VMEM((n_pad, K_CHEB * LANE), jnp.float32)],
    )
    out_pad = fn(l_pad, x_pad, p_pad, wpack, bpack)
    return out_pad[:num_graphs, :num_classes]


# ----------------------------------------------------------------------------- params & reference

def init_params(key, num_features=10, hidden=30, num_classes=3):
    """Deterministic synthetic parameters; weights stored as (in, out)."""
    ks = jax.random.split(key, 2 * K_CHEB + 6)

    def glorot(k, shape):
        fan_in, fan_out = shape
        lim = jnp.sqrt(6.0 / (fan_in + fan_out))
        return jax.random.uniform(k, shape, jnp.float32, -lim, lim)

    w1 = [glorot(ks[i], (num_features, hidden)) for i in range(K_CHEB)]
    w2 = [glorot(ks[K_CHEB + i], (hidden, hidden)) for i in range(K_CHEB)]
    b1 = jax.random.uniform(ks[2 * K_CHEB + 0], (hidden,), jnp.float32, -0.1, 0.1)
    b2 = jax.random.uniform(ks[2 * K_CHEB + 1], (hidden,), jnp.float32, -0.1, 0.1)
    wl1 = glorot(ks[2 * K_CHEB + 2], (hidden, hidden))
    bl1 = jax.random.uniform(ks[2 * K_CHEB + 3], (hidden,), jnp.float32, -0.1, 0.1)
    wl2 = glorot(ks[2 * K_CHEB + 4], (hidden, num_classes))
    bl2 = jax.random.uniform(ks[2 * K_CHEB + 5], (num_classes,), jnp.float32, -0.1, 0.1)
    return dict(w1=w1, b1=b1, w2=w2, b2=b2, wl1=wl1, bl1=bl1, wl2=wl2, bl2=bl2)


def _reference_forward(x, edge_index, params, edge_weights=None):
    """Pure-JAX reference (batch=None path) with the same ChebConv math."""
    n = x.shape[0]
    L = _build_scaled_laplacian(n, edge_index, edge_weights)
    x = x.astype(jnp.float32)

    def cheb(xin, ws, b):
        tx0 = xin
        out = tx0 @ ws[0]
        tx1 = L @ xin
        out = out + tx1 @ ws[1]
        for k in range(2, K_CHEB):
            tx2 = 2.0 * (L @ tx1) - tx0
            out = out + tx2 @ ws[k]
            tx0, tx1 = tx1, tx2
        return out + b

    h1 = jax.nn.relu(cheb(x, params["w1"], params["b1"]))
    h2 = jax.nn.relu(cheb(h1, params["w2"], params["b2"]))
    pooled = jnp.sum(h2, axis=0, keepdims=True)            # global_add_pool, single graph
    y = jax.nn.relu(pooled @ params["wl1"] + params["bl1"])
    return y @ params["wl2"] + params["bl2"]


# ----------------------------------------------------------------------------- main

if __name__ == "__main__":
    key = jax.random.PRNGKey(0)
    k_x, k_e = jax.random.split(key, 2)

    num_nodes, num_features, num_classes, num_edges = 16, 10, 3, 48
    x = jax.random.normal(k_x, (num_nodes, num_features), dtype=jnp.float32)
    edge_index = jax.random.randint(k_e, (2, num_edges), 0, num_nodes, dtype=jnp.int32)

    params = init_params(jax.random.PRNGKey(42), num_features, 30, num_classes)

    out = cheb_forward(x, edge_index, params, batch=None, edge_weights=None)
    out = jax.block_until_ready(out)

    ref = _reference_forward(x, edge_index, params, edge_weights=None)
    assert out.shape == (1, num_classes)
    assert jnp.allclose(out, ref, rtol=5e-3, atol=5e-3), (
        f"max abs diff {jnp.max(jnp.abs(out - ref))}")

    print("KERNEL_OK")
</pallas_src>

<mosaic_0001>
module attributes {stable_mosaic.version = 11 : i64} {
  func.func @_cheb_forward_kernel(%arg0: memref<16x16xf32, #tpu.memory_space<vmem>>, %arg1: memref<16x128xf32, #tpu.memory_space<vmem>>, %arg2: memref<8x16xf32, #tpu.memory_space<vmem>>, %arg3: memref<1536x128xf32, #tpu.memory_space<vmem>>, %arg4: memref<4x128xf32, #tpu.memory_space<vmem>>, %arg5: memref<8x128xf32, #tpu.memory_space<vmem>>, %arg6: memref<16x640xf32, #tpu.memory_space<vmem>>) attributes {dimension_semantics = [], scalar_prefetch = 0 : i64, scratch_operands = 1 : i64, tpu.core_type = #tpu.core_type<tc>} {
    %c0 = arith.constant 0 : index
    %c0_0 = arith.constant 0 : index
    %0 = vector.load %arg0[%c0, %c0_0] : memref<16x16xf32, #tpu.memory_space<vmem>>, vector<16x16xf32>
    %c0_1 = arith.constant 0 : index
    %c0_2 = arith.constant 0 : index
    %1 = vector.load %arg1[%c0_1, %c0_2] : memref<16x128xf32, #tpu.memory_space<vmem>>, vector<16x128xf32>
    %c0_3 = arith.constant 0 : index
    %c0_4 = arith.constant 0 : index
    %2 = vector.load %arg6[%c0_3, %c0_4] : memref<16x640xf32, #tpu.memory_space<vmem>>, vector<16x128xf32>
    tpu.vector_store %arg6[%c0_3, %c0_4], %1 {strides = array<i32>} : memref<16x640xf32, #tpu.memory_space<vmem>>, vector<16x128xf32>,
    %cst = arith.constant dense<0.000000e+00> : vector<16x128xf32>
    %3 = tpu.matmul %0, %1, %cst {dimension_numbers = #tpu.dot_dimension_numbers<[1], [0], [0], [1], [0, 0, 1, 1], [], []>} : vector<16x16xf32>, vector<16x128xf32>, vector<16x128xf32> -> vector<16x128xf32>
    %c0_5 = arith.constant 0 : index
    %c128 = arith.constant 128 : index
    %4 = vector.load %arg6[%c0_5, %c128] : memref<16x640xf32, #tpu.memory_space<vmem>>, vector<16x128xf32>
    tpu.vector_store %arg6[%c0_5, %c128], %3 {strides = array<i32>} : memref<16x640xf32, #tpu.memory_space<vmem>>, vector<16x128xf32>,
    %cst_6 = arith.constant dense<0.000000e+00> : vector<16x128xf32>
    %5 = tpu.matmul %0, %3, %cst_6 {dimension_numbers = #tpu.dot_dimension_numbers<[1], [0], [0], [1], [0, 0, 1, 1], [], []>} : vector<16x16xf32>, vector<16x128xf32>, vector<16x128xf32> -> vector<16x128xf32>
    %cst_7 = arith.constant 2.000000e+00 : f32
    %6 = vector.broadcast %cst_7 : f32 to vector<16x128xf32>
    %7 = arith.mulf %6, %5 : vector<16x128xf32>
    %8 = arith.subf %7, %1 : vector<16x128xf32>
    %c0_8 = arith.constant 0 : index
    %c256 = arith.constant 256 : index
    %9 = vector.load %arg6[%c0_8, %c256] : memref<16x640xf32, #tpu.memory_space<vmem>>, vector<16x128xf32>
    tpu.vector_store %arg6[%c0_8, %c256], %8 {strides = array<i32>} : memref<16x640xf32, #tpu.memory_space<vmem>>, vector<16x128xf32>,
    %cst_9 = arith.constant dense<0.000000e+00> : vector<16x128xf32>
    %10 = tpu.matmul %0, %8, %cst_9 {dimension_numbers = #tpu.dot_dimension_numbers<[1], [0], [0], [1], [0, 0, 1, 1], [], []>} : vector<16x16xf32>, vector<16x128xf32>, vector<16x128xf32> -> vector<16x128xf32>
    %cst_10 = arith.constant 2.000000e+00 : f32
    %11 = vector.broadcast %cst_10 : f32 to vector<16x128xf32>
    %12 = arith.mulf %11, %10 : vector<16x128xf32>
    %13 = arith.subf %12, %3 : vector<16x128xf32>
    %c0_11 = arith.constant 0 : index
    %c384 = arith.constant 384 : index
    %14 = vector.load %arg6[%c0_11, %c384] : memref<16x640xf32, #tpu.memory_space<vmem>>, vector<16x128xf32>
    tpu.vector_store %arg6[%c0_11, %c384], %13 {strides = array<i32>} : memref<16x640xf32, #tpu.memory_space<vmem>>, vector<16x128xf32>,
    %cst_12 = arith.constant dense<0.000000e+00> : vector<16x128xf32>
    %15 = tpu.matmul %0, %13, %cst_12 {dimension_numbers = #tpu.dot_dimension_numbers<[1], [0], [0], [1], [0, 0, 1, 1], [], []>} : vector<16x16xf32>, vector<16x128xf32>, vector<16x128xf32> -> vector<16x128xf32>
    %cst_13 = arith.constant 2.000000e+00 : f32
    %16 = vector.broadcast %cst_13 : f32 to vector<16x128xf32>
    %17 = arith.mulf %16, %15 : vector<16x128xf32>
    %18 = arith.subf %17, %8 : vector<16x128xf32>
    %c0_14 = arith.constant 0 : index
    %c512 = arith.constant 512 : index
    %19 = vector.load %arg6[%c0_14, %c512] : memref<16x640xf32, #tpu.memory_space<vmem>>, vector<16x128xf32>
    tpu.vector_store %arg6[%c0_14, %c512], %18 {strides = array<i32>} : memref<16x640xf32, #tpu.memory_space<vmem>>, vector<16x128xf32>,
    %c0_15 = arith.constant 0 : index
    %c0_16 = arith.constant 0 : index
    %20 = vector.load %arg3[%c0_15, %c0_16] : memref<1536x128xf32, #tpu.memory_space<vmem>>, vector<640x128xf32>
    %c0_17 = arith.constant 0 : index
    %c0_18 = arith.constant 0 : index
    %21 = vector.load %arg6[%c0_17, %c0_18] : memref<16x640xf32, #tpu.memory_space<vmem>>, vector<16x640xf32>
    %cst_19 = arith.constant dense<0.000000e+00> : vector<16x128xf32>
    %22 = tpu.matmul %21, %20, %cst_19 {dimension_numbers = #tpu.dot_dimension_numbers<[1], [0], [0], [1], [0, 0, 1, 1], [], []>} : vector<16x640xf32>, vector<640x128xf32>, vector<16x128xf32> -> vector<16x128xf32>
    %c0_20 = arith.constant 0 : index
    %c0_21 = arith.constant 0 : index
    %23 = vector.load %arg4[%c0_20, %c0_21] : memref<4x128xf32, #tpu.memory_space<vmem>>, vector<1x128xf32>
    %24 = vector.broadcast %23 : vector<1x128xf32> to vector<16x128xf32>
    %25 = arith.addf %22, %24 : vector<16x128xf32>
    %cst_22 = arith.constant 0.000000e+00 : f32
    %26 = vector.broadcast %cst_22 : f32 to vector<16x128xf32>
    %27 = arith.maximumf %25, %26 : vector<16x128xf32>
    %c0_23 = arith.constant 0 : index
    %c0_24 = arith.constant 0 : index
    %28 = vector.load %arg6[%c0_23, %c0_24] : memref<16x640xf32, #tpu.memory_space<vmem>>, vector<16x128xf32>
    tpu.vector_store %arg6[%c0_23, %c0_24], %27 {strides = array<i32>} : memref<16x640xf32, #tpu.memory_space<vmem>>, vector<16x128xf32>,
    %cst_25 = arith.constant dense<0.000000e+00> : vector<16x128xf32>
    %29 = tpu.matmul %0, %27, %cst_25 {dimension_numbers = #tpu.dot_dimension_numbers<[1], [0], [0], [1], [0, 0, 1, 1], [], []>} : vector<16x16xf32>, vector<16x128xf32>, vector<16x128xf32> -> vector<16x128xf32>
    %c0_26 = arith.constant 0 : index
    %c128_27 = arith.constant 128 : index
    %30 = vector.load %arg6[%c0_26, %c128_27] : memref<16x640xf32, #tpu.memory_space<vmem>>, vector<16x128xf32>
    tpu.vector_store %arg6[%c0_26, %c128_27], %29 {strides = array<i32>} : memref<16x640xf32, #tpu.memory_space<vmem>>, vector<16x128xf32>,
    %cst_28 = arith.constant dense<0.000000e+00> : vector<16x128xf32>
    %31 = tpu.matmul %0, %29, %cst_28 {dimension_numbers = #tpu.dot_dimension_numbers<[1], [0], [0], [1], [0, 0, 1, 1], [], []>} : vector<16x16xf32>, vector<16x128xf32>, vector<16x128xf32> -> vector<16x128xf32>
    %cst_29 = arith.constant 2.000000e+00 : f32
    %32 = vector.broadcast %cst_29 : f32 to vector<16x128xf32>
    %33 = arith.mulf %32, %31 : vector<16x128xf32>
    %34 = arith.subf %33, %27 : vector<16x128xf32>
    %c0_30 = arith.constant 0 : index
    %c256_31 = arith.constant 256 : index
    %35 = vector.load %arg6[%c0_30, %c256_31] : memref<16x640xf32, #tpu.memory_space<vmem>>, vector<16x128xf32>
    tpu.vector_store %arg6[%c0_30, %c256_31], %34 {strides = array<i32>} : memref<16x640xf32, #tpu.memory_space<vmem>>, vector<16x128xf32>,
    %cst_32 = arith.constant dense<0.000000e+00> : vector<16x128xf32>
    %36 = tpu.matmul %0, %34, %cst_32 {dimension_numbers = #tpu.dot_dimension_numbers<[1], [0], [0], [1], [0, 0, 1, 1], [], []>} : vector<16x16xf32>, vector<16x128xf32>, vector<16x128xf32> -> vector<16x128xf32>
    %cst_33 = arith.constant 2.000000e+00 : f32
    %37 = vector.broadcast %cst_33 : f32 to vector<16x128xf32>
    %38 = arith.mulf %37, %36 : vector<16x128xf32>
    %39 = arith.subf %38, %29 : vector<16x128xf32>
    %c0_34 = arith.constant 0 : index
    %c384_35 = arith.constant 384 : index
    %40 = vector.load %arg6[%c0_34, %c384_35] : memref<16x640xf32, #tpu.memory_space<vmem>>, vector<16x128xf32>
    tpu.vector_store %arg6[%c0_34, %c384_35], %39 {strides = array<i32>} : memref<16x640xf32, #tpu.memory_space<vmem>>, vector<16x128xf32>,
    %cst_36 = arith.constant dense<0.000000e+00> : vector<16x128xf32>
    %41 = tpu.matmul %0, %39, %cst_36 {dimension_numbers = #tpu.dot_dimension_numbers<[1], [0], [0], [1], [0, 0, 1, 1], [], []>} : vector<16x16xf32>, vector<16x128xf32>, vector<16x128xf32> -> vector<16x128xf32>
    %cst_37 = arith.constant 2.000000e+00 : f32
    %42 = vector.broadcast %cst_37 : f32 to vector<16x128xf32>
    %43 = arith.mulf %42, %41 : vector<16x128xf32>
    %44 = arith.subf %43, %34 : vector<16x128xf32>
    %c0_38 = arith.constant 0 : index
    %c512_39 = arith.constant 512 : index
    %45 = vector.load %arg6[%c0_38, %c512_39] : memref<16x640xf32, #tpu.memory_space<vmem>>, vector<16x128xf32>
    tpu.vector_store %arg6[%c0_38, %c512_39], %44 {strides = array<i32>} : memref<16x640xf32, #tpu.memory_space<vmem>>, vector<16x128xf32>,
    %c640 = arith.constant 640 : index
    %c0_40 = arith.constant 0 : index
    %46 = vector.load %arg3[%c640, %c0_40] : memref<1536x128xf32, #tpu.memory_space<vmem>>, vector<640x128xf32>
    %c0_41 = arith.constant 0 : index
    %c0_42 = arith.constant 0 : index
    %47 = vector.load %arg6[%c0_41, %c0_42] : memref<16x640xf32, #tpu.memory_space<vmem>>, vector<16x640xf32>
    %cst_43 = arith.constant dense<0.000000e+00> : vector<16x128xf32>
    %48 = tpu.matmul %47, %46, %cst_43 {dimension_numbers = #tpu.dot_dimension_numbers<[1], [0], [0], [1], [0, 0, 1, 1], [], []>} : vector<16x640xf32>, vector<640x128xf32>, vector<16x128xf32> -> vector<16x128xf32>
    %c1 = arith.constant 1 : index
    %c0_44 = arith.constant 0 : index
    %49 = vector.load %arg4[%c1, %c0_44] : memref<4x128xf32, #tpu.memory_space<vmem>>, vector<1x128xf32>
    %50 = vector.broadcast %49 : vector<1x128xf32> to vector<16x128xf32>
    %51 = arith.addf %48, %50 : vector<16x128xf32>
    %cst_45 = arith.constant 0.000000e+00 : f32
    %52 = vector.broadcast %cst_45 : f32 to vector<16x128xf32>
    %53 = arith.maximumf %51, %52 : vector<16x128xf32>
    %c0_46 = arith.constant 0 : index
    %c0_47 = arith.constant 0 : index
    %54 = vector.load %arg2[%c0_46, %c0_47] : memref<8x16xf32, #tpu.memory_space<vmem>>, vector<8x16xf32>
    %cst_48 = arith.constant dense<0.000000e+00> : vector<8x128xf32>
    %55 = tpu.matmul %54, %53, %cst_48 {dimension_numbers = #tpu.dot_dimension_numbers<[1], [0], [0], [1], [0, 0, 1, 1], [], []>} : vector<8x16xf32>, vector<16x128xf32>, vector<8x128xf32> -> vector<8x128xf32>
    %c1280 = arith.constant 1280 : index
    %c0_49 = arith.constant 0 : index
    %56 = vector.load %arg3[%c1280, %c0_49] : memref<1536x128xf32, #tpu.memory_space<vmem>>, vector<128x128xf32>
    %cst_50 = arith.constant dense<0.000000e+00> : vector<8x128xf32>
    %57 = tpu.matmul %55, %56, %cst_50 {dimension_numbers = #tpu.dot_dimension_numbers<[1], [0], [0], [1], [0, 0, 1, 1], [], []>} : vector<8x128xf32>, vector<128x128xf32>, vector<8x128xf32> -> vector<8x128xf32>
    %c2 = arith.constant 2 : index
    %c0_51 = arith.constant 0 : index
    %58 = vector.load %arg4[%c2, %c0_51] : memref<4x128xf32, #tpu.memory_space<vmem>>, vector<1x128xf32>
    %59 = vector.broadcast %58 : vector<1x128xf32> to vector<8x128xf32>
    %60 = arith.addf %57, %59 : vector<8x128xf32>
    %cst_52 = arith.constant 0.000000e+00 : f32
    %61 = vector.broadcast %cst_52 : f32 to vector<8x128xf32>
    %62 = arith.maximumf %60, %61 : vector<8x128xf32>
    %c1408 = arith.constant 1408 : index
    %c0_53 = arith.constant 0 : index
    %63 = vector.load %arg3[%c1408, %c0_53] : memref<1536x128xf32, #tpu.memory_space<vmem>>, vector<128x128xf32>
    %cst_54 = arith.constant dense<0.000000e+00> : vector<8x128xf32>
    %64 = tpu.matmul %62, %63, %cst_54 {dimension_numbers = #tpu.dot_dimension_numbers<[1], [0], [0], [1], [0, 0, 1, 1], [], []>} : vector<8x128xf32>, vector<128x128xf32>, vector<8x128xf32> -> vector<8x128xf32>
    %c3 = arith.constant 3 : index
    %c0_55 = arith.constant 0 : index
    %65 = vector.load %arg4[%c3, %c0_55] : memref<4x128xf32, #tpu.memory_space<vmem>>, vector<1x128xf32>
    %66 = vector.broadcast %65 : vector<1x128xf32> to vector<8x128xf32>
    %67 = arith.addf %64, %66 : vector<8x128xf32>
    %c0_56 = arith.constant 0 : index
    %c0_57 = arith.constant 0 : index
    %68 = vector.load %arg5[%c0_56, %c0_57] : memref<8x128xf32, #tpu.memory_space<vmem>>, vector<8x128xf32>
    tpu.vector_store %arg5[%c0_56, %c0_57], %67 {strides = array<i32>} : memref<8x128xf32, #tpu.memory_space<vmem>>, vector<8x128xf32>,
    return
  }
}

</mosaic_0001>

<bundles_post_ra>
// kernel: tpu_custom_call.1
= control target key start
LH: loop header
LB: loop body
LE: loop exit
PB: predicated region body
PF: predicated region fallthrough
CT: control target
= control target key end

     0   :  { %10 = vsyncpa [#allocation4], 0  ;;  %s2475_s0 = inlined_call_operand.hbm [shape: f32[16,16], index: 0, kind: input, shape index: {}]   ;;  %s2476_s1 = inlined_call_operand.hbm [shape: f32[16,128], index: 1, kind: input, shape index: {}]   ;;  %s2477_s2 = inlined_call_operand.hbm [shape: f32[8,16], index: 2, kind: input, shape index: {}]   ;;  %s2478_s3 = inlined_call_operand.hbm [shape: f32[1536,128], index: 3, kind: input, shape index: {}]   ;;  %s2479_s4 = inlined_call_operand.vmem [shape: f32[4,128], index: 4, kind: input, shape index: {}]   ;;  %s2480_s5 = inlined_call_operand.hbm [shape: f32[8,128], index: 5, kind: output, shape index: {}]  }
   0x1   :  { %11 = vsyncpa [#allocation7], 0 }
   0x2   :  { %12 = vsyncpa [#allocation10], 0 }
   0x3   :  { %13 = vsyncpa [#allocation5], 0  ;;  %s2246_s18 = smov [#allocation6]   ;;  %s2247_s20 = smov [#allocation3]  }
   0x4   :  { %s31_s19 = sshll.u32 %s2246_s18, 4  ;;  %s19_s21 = sshll.u32 %s2247_s20, 4  ;;  %s32_s19 = int_to_ptr.vmem [resolvable:$true] %s31_s19  ;;  %s20_s21 = int_to_ptr.vmem [resolvable:$true] %s19_s21 }
   0x5   :  { %s2146_s22 = scalar_lea.vmem %s32_s19, 256  ;;  %p2151_p1 = scmp.lt.s32.totalorder %s32_s19, %s32_s19 }
   0x6   :  { %p2147_p0 = scmp.ne.s32.totalorder %s32_s19, %s2146_s22  ;;  %p2152_p2 = scmp.lt.s32.totalorder %s2146_s22, %s2146_s22 }
   0x8   :  { %p2153_p3 = por %p2152_p2, %p2151_p1 }
   0xa   :  { %p2154_p4 = pnand %p2153_p3, %p2147_p0 }
   0xc   :  { %2157 = shalt.err (!%p2154_p4)
}
   0xd   :  { %s2248_s23 = smov 128   ;;  %s2249_s24 = smov 8  }
   0xe   :  { %37 = dma.hbm_to_vmem [thread:$0]  %s2476_s1, 256, %s32_s19, [#allocation7], %s2248_s23, %s2248_s23, %s2249_s24  }
   0xf   :  { %s2166_s27 = scalar_lea.vmem %s20_s21, 256  ;;  %p2171_p6 = scmp.lt.s32.totalorder %s20_s21, %s20_s21 }
  0x10   :  { %p2167_p5 = scmp.ne.s32.totalorder %s20_s21, %s2166_s27  ;;  %p2172_p7 = scmp.lt.s32.totalorder %s2166_s27, %s2166_s27 }
  0x12   :  { %p2173_p8 = por %p2172_p7, %p2171_p6 }
  0x14   :  { %p2174_p9 = pnand %p2173_p8, %p2167_p5 }
  0x16   :  { %2177 = shalt.err (!%p2174_p9)
}
  0x17   :  { %25 = dma.hbm_to_vmem [thread:$0]  %s2475_s0, 256, %s20_s21, [#allocation4], %s2248_s23, %s2248_s23, %s2249_s24  }
  0x18   :  { %s2250_s30 = smov [#allocation8]   ;;  %s2251_s7 = smov [#allocation9]  }
  0x19   :  { %s44_s6 = sshll.u32 %s2250_s30, 4  ;;  %s53_s8 = sshll.u32 %s2251_s7, 4  ;;  %s45_s6 = int_to_ptr.vmem [resolvable:$true] %s44_s6  ;;  %s54_s8 = int_to_ptr.vmem [resolvable:$true] %s53_s8 }
  0x1a   :  { %s2186_s1 = scalar_lea.vmem %s45_s6, 128  ;;  %p2191_p11 = scmp.lt.s32.totalorder %s45_s6, %s45_s6 }
  0x1b   :  { %p2187_p10 = scmp.ne.s32.totalorder %s45_s6, %s2186_s1  ;;  %p2192_p12 = scmp.lt.s32.totalorder %s2186_s1, %s2186_s1 }
  0x1d   :  { %p2193_p13 = por %p2192_p12, %p2191_p11 }
  0x1f   :  { %p2194_p0 = pnand %p2193_p13, %p2187_p10 }
  0x21   :  { %2197 = shalt.err (!%p2194_p0)
}
  0x22   :  { %47 = dma.hbm_to_vmem [thread:$0]  %s2477_s2, 128, %s45_s6, [#allocation7]  }
  0x23   :  { %s2206_s11 = scalar_lea.vmem %s54_s8, 24576  ;;  %p2211_p2 = scmp.lt.s32.totalorder %s54_s8, %s54_s8 }
  0x24   :  { %p2207_p1 = scmp.ne.s32.totalorder %s54_s8, %s2206_s11  ;;  %p2212_p3 = scmp.lt.s32.totalorder %s2206_s11, %s2206_s11 }
  0x26   :  { %p2213_p4 = por %p2212_p3, %p2211_p2 }
  0x28   :  { %p2214_p5 = pnand %p2213_p4, %p2207_p1 }
  0x2a   :  { %2217 = shalt.err (!%p2214_p5)
}
  0x2b   :  { %59 = dma.hbm_to_vmem [thread:$0]  %s2478_s3, 24576, %s54_s8, [#allocation10], %s2248_s23, %s2248_s23, %s2249_s24  }
  0x2c   :  { %2238 = dma.done.wait [#allocation4], 256  }
  0x2d   :  { %2239 = vsyncadd [#allocation4], 4294967040 }
  0x2e   :  { %2240 = dma.done.wait [#allocation7], 384  }
  0x2f   :  { %2241 = vsyncadd [#allocation7], 4294966912 }
  0x30   :  { %2242 = dma.done.wait [#allocation10], 24576  }
  0x31   :  { %2243 = vsyncadd [#allocation10], 4294942720  ;;  %vm80_vm0 = vcmask 130048   ;;  %v2306_v0 = vld [vmem:[#allocation6 + $0x8] sm:$0xff]  ;;  %v2308_v1 = vld [vmem:[#allocation6] sm:$0xff]  ;;  %vm2253_vm1 = vmmov 0  }
  0x32   :  { %v2310_v2 = vld [vmem:[#allocation3] sm:$0xff]  ;;  %1926 = vmatprep.subr.mxu0 %v2306_v0  ;;  %v2316_v3 = vld [vmem:[#allocation3 + $0x8] sm:$0xff]  ;;  %v437_v14 = vld [vmem:[#allocation9 + $0xf0] sm:$0xff]  ;;  %s2254_s19 = smov [#allocation11]  }
  0x33   :  { %1930 = vmatprep.mubr.msk.f32.mxu0 %vm80_vm0, %v2310_v2  ;;  %1927 = vmatpush3.msra.mxu0 %v2306_v0  ;;  %v438_v12 = vld [vmem:[#allocation9 + $0xf8] sm:$0xff]  ;;  %v421_v15 = vld [vmem:[#allocation9 + $0x70] sm:$0xff]  ;;  %v436_v16 = vld [vmem:[#allocation9 + $0xe8] sm:$0xff]  ;;  %s1637_s20 = sshll.u32 %s2254_s19, 4  ;;  %s1638_s20 = int_to_ptr.vmem [resolvable:$true] %s1637_s20 }
  0x34   :  { %1951 = vmatprep.mubr.msk.f32.mxu1 %vm80_vm0, %v2310_v2  ;;  %1928 = vmatprep.subr.mxu0 %v2308_v1  ;;  %v422_v13 = vld [vmem:[#allocation9 + $0x78] sm:$0xff]  ;;  %v420_v17 = vld [vmem:[#allocation9 + $0x68] sm:$0xff]  ;;  %v435_v18 = vld [vmem:[#allocation9 + $0xe0] sm:$0xff]  ;;  %s2218_s21 = scalar_lea.vmem %s1638_s20, 128  ;;  %p2223_p7 = scmp.lt.s32.totalorder %s1638_s20, %s1638_s20 }
  0x35   :  { %1929 = vmatpush3.msra.mxu0 %v2308_v1  ;;  %v419_v19 = vld [vmem:[#allocation9 + $0x60] sm:$0xff]  ;;  %v434_v20 = vld [vmem:[#allocation9 + $0xd8] sm:$0xff]  ;;  %v433_v22 = vld [vmem:[#allocation9 + $0xd0] sm:$0xff]  ;;  %p2219_p6 = scmp.ne.s32.totalorder %s1638_s20, %s2218_s21  ;;  %p2224_p8 = scmp.lt.s32.totalorder %s2218_s21, %s2218_s21 }
  0x36   :  { %1931 = vmatmul.mubr.msk.f32.vlgmr.msra.gmra.mxu0 %vm80_vm0, %v2316_v3  ;;  %v418_v21 = vld [vmem:[#allocation9 + $0x58] sm:$0xff]  ;;  %v417_v23 = vld [vmem:[#allocation9 + $0x50] sm:$0xff]  ;;  %v432_v24 = vld [vmem:[#allocation9 + $0xc8] sm:$0xff] }
  0x37   :  { %1937 = vmatprep.mubr.msk.f32.mxu0 %vm80_vm0, %v2310_v2  ;;  %v416_v25 = vld [vmem:[#allocation9 + $0x48] sm:$0xff]  ;;  %v431_v26 = vld [vmem:[#allocation9 + $0xc0] sm:$0xff]  ;;  %v430_v28 = vld [vmem:[#allocation9 + $0xb8] sm:$0xff]  ;;  %p2225_p9 = por %p2224_p8, %p2223_p7 }
  0x38   :  { %v415_v27 = vld [vmem:[#allocation9 + $0x40] sm:$0xff]  ;;  %v414_v29 = vld [vmem:[#allocation9 + $0x38] sm:$0xff]  ;;  %v429_v30 = vld [vmem:[#allocation9 + $0xb0] sm:$0xff] }
  0x39   :  { %v413_v31 = vld [vmem:[#allocation9 + $0x30] sm:$0xff]  ;;  %v428_v32 = vld [vmem:[#allocation9 + $0xa8] sm:$0xff]  ;;  %v427_v34 = vld [vmem:[#allocation9 + $0xa0] sm:$0xff]  ;;  %p2226_p10 = pnand %p2225_p9, %p2219_p6 }
  0x3a   :  { %v412_v33 = vld [vmem:[#allocation9 + $0x28] sm:$0xff]  ;;  %v411_v35 = vld [vmem:[#allocation9 + $0x20] sm:$0xff]  ;;  %v426_v36 = vld [vmem:[#allocation9 + $0x98] sm:$0xff] }
  0x3b   :  { %v410_v37 = vld [vmem:[#allocation9 + $0x18] sm:$0xff]  ;;  %v425_v38 = vld [vmem:[#allocation9 + $0x90] sm:$0xff]  ;;  %v424_v40 = vld [vmem:[#allocation9 + $0x88] sm:$0xff] }
  0x3c   :  { %v409_v39 = vld [vmem:[#allocation9 + $0x10] sm:$0xff]  ;;  %v408_v41 = vld [vmem:[#allocation9 + $0x8] sm:$0xff]  ;;  %v423_v42 = vld [vmem:[#allocation9 + $0x80] sm:$0xff] }
  0x3d   :  { %v407_v43 = vld [vmem:[#allocation9] sm:$0xff]  ;;  %v486_v44 = vld [vmem:[#allocation9 + $0x278] sm:$0xff]  ;;  %v485_v45 = vld [vmem:[#allocation9 + $0x270] sm:$0xff] }
  0x3e   :  { %v484_v46 = vld [vmem:[#allocation9 + $0x268] sm:$0xff]  ;;  %v483_v47 = vld [vmem:[#allocation9 + $0x260] sm:$0xff]  ;;  %v482_v48 = vld [vmem:[#allocation9 + $0x258] sm:$0xff] }
  0x3f   :  { %v481_v49 = vld [vmem:[#allocation9 + $0x250] sm:$0xff]  ;;  %v480_v50 = vld [vmem:[#allocation9 + $0x248] sm:$0xff]  ;;  %v479_v51 = vld [vmem:[#allocation9 + $0x240] sm:$0xff] }
  0x40   :  { %v478_v52 = vld [vmem:[#allocation9 + $0x238] sm:$0xff]  ;;  %v477_v53 = vld [vmem:[#allocation9 + $0x230] sm:$0xff]  ;;  %v476_v54 = vld [vmem:[#allocation9 + $0x228] sm:$0xff] }
  0x41   :  { %v475_v55 = vld [vmem:[#allocation9 + $0x220] sm:$0xff]  ;;  %v470_v62 = vld [vmem:[#allocation9 + $0x1f8] sm:$0xff] }
  0x42   :  { %v454_v63 = vld [vmem:[#allocation9 + $0x178] sm:$0xff] }
  0xf6   :  { %v2326_v4 = vpop.f32.mrf.mxu0 }
  0xf7   :  { %1933 = vmatprep.subr.mxu0 %v2326_v4 }
  0xf8   :  { %v2329_v5 = vpop.f32.mrf.mxu0  ;;  %1934 = vmatpush3.msra.mxu0 %v2326_v4 }
  0xf9   :  { %1935 = vmatprep.subr.mxu0 %v2329_v5 }
  0xfa   :  { %1936 = vmatpush3.msra.mxu0 %v2329_v5 }
  0xfb   :  { %1938 = vmatmul.mubr.msk.f32.vlgmr.msra.gmra.mxu0 %vm80_vm0, %v2316_v3 }
  0xfc   :  { %1944 = vmatprep.mubr.msk.f32.mxu0 %vm80_vm0, %v2310_v2 }
 0x1bb   :  { %v1939_v6 = vpop.f32.mrf.mxu0 }
 0x1bc   :  { %v240_v7 = vmul.f32 2.0, %v1939_v6  ;;  %v452_v6 = vld [vmem:[#allocation9 + $0x168] sm:$0xff] }
 0x1bd   :  { %v230_v8 = vpop.f32.mrf.mxu0 }
 0x1be   :  { %v2339_v9 = vsub.f32 %v240_v7, %v2306_v0  ;;  %v239_v10 = vmul.f32 2.0, %v230_v8  ;;  %v451_v7 = vld [vmem:[#allocation9 + $0x160] sm:$0xff]  ;;  %v466_v8 = vld [vmem:[#allocation9 + $0x1d8] sm:$0xff] }
 0x1c0   :  { %v2342_v11 = vsub.f32 %v239_v10, %v2308_v1  ;;  %1940 = vmatprep.subr.mxu0 %v2339_v9  ;;  %v450_v10 = vld [vmem:[#allocation9 + $0x158] sm:$0xff] }
 0x1c1   :  { %1941 = vmatpush3.msra.mxu0 %v2339_v9 }
 0x1c2   :  { %1942 = vmatprep.subr.mxu0 %v2342_v11 }
 0x1c3   :  { %1943 = vmatpush3.msra.mxu0 %v2342_v11 }
 0x1c4   :  { %1945 = vmatmul.mubr.msk.f32.vlgmr.msra.gmra.mxu0 %vm80_vm0, %v2316_v3  ;;  %1685 = vmatprep.subr.mxu0 %v438_v12  ;;  %v465_v12 = vld [vmem:[#allocation9 + $0x1d0] sm:$0xff] }
 0x1c5   :  { %1686 = vmatpush3.msra.mxu0 %v422_v13  ;;  %566 = vmatprep.mubr.f32.mxu0 %v2329_v5  ;;  %v449_v13 = vld [vmem:[#allocation9 + $0x150] sm:$0xff] }
 0x1c6   :  { %1687 = vmatprep.subr.mxu0 %v437_v14  ;;  %v464_v14 = vld [vmem:[#allocation9 + $0x1c8] sm:$0xff] }
 0x1c7   :  { %1688 = vmatpush3.msra.mxu0 %v421_v15  ;;  %v448_v15 = vld [vmem:[#allocation9 + $0x148] sm:$0xff] }
 0x1c8   :  { %1689 = vmatprep.subr.mxu0 %v436_v16  ;;  %v463_v16 = vld [vmem:[#allocation9 + $0x1c0] sm:$0xff] }
 0x1c9   :  { %1690 = vmatpush3.msra.mxu0 %v420_v17  ;;  %v447_v17 = vld [vmem:[#allocation9 + $0x140] sm:$0xff] }
 0x1ca   :  { %1691 = vmatprep.subr.mxu0 %v435_v18  ;;  %v462_v18 = vld [vmem:[#allocation9 + $0x1b8] sm:$0xff] }
 0x1cb   :  { %1692 = vmatpush3.msra.mxu0 %v419_v19  ;;  %v446_v19 = vld [vmem:[#allocation9 + $0x138] sm:$0xff] }
 0x1cc   :  { %1693 = vmatprep.subr.mxu0 %v434_v20  ;;  %v461_v20 = vld [vmem:[#allocation9 + $0x1b0] sm:$0xff] }
 0x1cd   :  { %1694 = vmatpush3.msra.mxu0 %v418_v21  ;;  %v445_v21 = vld [vmem:[#allocation9 + $0x130] sm:$0xff] }
 0x1ce   :  { %1695 = vmatprep.subr.mxu0 %v433_v22  ;;  %v460_v22 = vld [vmem:[#allocation9 + $0x1a8] sm:$0xff] }
 0x1cf   :  { %1696 = vmatpush3.msra.mxu0 %v417_v23  ;;  %v444_v23 = vld [vmem:[#allocation9 + $0x128] sm:$0xff] }
 0x1d0   :  { %1697 = vmatprep.subr.mxu0 %v432_v24  ;;  %v459_v24 = vld [vmem:[#allocation9 + $0x1a0] sm:$0xff] }
 0x1d1   :  { %1698 = vmatpush3.msra.mxu0 %v416_v25  ;;  %v443_v25 = vld [vmem:[#allocation9 + $0x120] sm:$0xff] }
 0x1d2   :  { %1699 = vmatprep.subr.mxu0 %v431_v26  ;;  %v458_v26 = vld [vmem:[#allocation9 + $0x198] sm:$0xff] }
 0x1d3   :  { %1700 = vmatpush3.msra.mxu0 %v415_v27  ;;  %v442_v27 = vld [vmem:[#allocation9 + $0x118] sm:$0xff] }
 0x1d4   :  { %1701 = vmatprep.subr.mxu0 %v430_v28  ;;  %v457_v28 = vld [vmem:[#allocation9 + $0x190] sm:$0xff] }
 0x1d5   :  { %1702 = vmatpush3.msra.mxu0 %v414_v29  ;;  %v441_v29 = vld [vmem:[#allocation9 + $0x110] sm:$0xff] }
 0x1d6   :  { %1703 = vmatprep.subr.mxu0 %v429_v30  ;;  %v456_v30 = vld [vmem:[#allocation9 + $0x188] sm:$0xff] }
 0x1d7   :  { %1704 = vmatpush3.msra.mxu0 %v413_v31  ;;  %v440_v31 = vld [vmem:[#allocation9 + $0x108] sm:$0xff] }
 0x1d8   :  { %1705 = vmatprep.subr.mxu0 %v428_v32  ;;  %v455_v32 = vld [vmem:[#allocation9 + $0x180] sm:$0xff] }
 0x1d9   :  { %1706 = vmatpush3.msra.mxu0 %v412_v33  ;;  %v439_v33 = vld [vmem:[#allocation9 + $0x100] sm:$0xff] }
 0x1da   :  { %1707 = vmatprep.subr.mxu0 %v427_v34  ;;  %v474_v34 = vld [vmem:[#allocation9 + $0x218] sm:$0xff] }
 0x1db   :  { %1708 = vmatpush3.msra.mxu0 %v411_v35  ;;  %v473_v35 = vld [vmem:[#allocation9 + $0x210] sm:$0xff] }
 0x1dc   :  { %1709 = vmatprep.subr.mxu0 %v426_v36  ;;  %v472_v36 = vld [vmem:[#allocation9 + $0x208] sm:$0xff] }
 0x1dd   :  { %1710 = vmatpush3.msra.mxu0 %v410_v37  ;;  %v471_v37 = vld [vmem:[#allocation9 + $0x200] sm:$0xff] }
 0x1de   :  { %1711 = vmatprep.subr.mxu0 %v425_v38 }
 0x1df   :  { %1712 = vmatpush3.msra.mxu0 %v409_v39 }
 0x1e0   :  { %1713 = vmatprep.subr.mxu0 %v424_v40 }
 0x1e1   :  { %1714 = vmatpush3.msra.mxu0 %v408_v41 }
 0x1e2   :  { %1715 = vmatprep.subr.mxu0 %v423_v42 }
 0x1e3   :  { %1716 = vmatpush3.msra.mxu0 %v407_v43 }
 0x1e4   :  { %567 = vmatmul.mubr.f32.vlgmr.msra.gmra.mxu0 %v2308_v1  ;;  %1954 = vmatprep.subr.mxu0 %v486_v44  ;;  %v453_v1 = vld [vmem:[#allocation9 + $0x170] sm:$0xff] }
 0x1e5   :  { %571 = vmatprep.mubr.f32.mxu0 %v2326_v4  ;;  %1955 = vmatpush3.msra.mxu0 %v486_v44 }
 0x1e6   :  { %1956 = vmatprep.subr.mxu0 %v485_v45 }
 0x1e7   :  { %1957 = vmatpush3.msra.mxu0 %v485_v45 }
 0x1e8   :  { %572 = vmatmul.mubr.f32.gmra.mxu0 %v2306_v0  ;;  %1958 = vmatprep.subr.mxu0 %v484_v46  ;;  %v469_v0 = vld [vmem:[#allocation9 + $0x1f0] sm:$0xff] }
 0x1e9   :  { %1959 = vmatpush3.msra.mxu0 %v484_v46 }
 0x1ea   :  { %1960 = vmatprep.subr.mxu0 %v483_v47 }
 0x1eb   :  { %1961 = vmatpush3.msra.mxu0 %v483_v47 }
 0x1ec   :  { %1962 = vmatprep.subr.mxu0 %v482_v48 }
 0x1ed   :  { %1963 = vmatpush3.msra.mxu0 %v482_v48 }
 0x1ee   :  { %1964 = vmatprep.subr.mxu0 %v481_v49 }
 0x1ef   :  { %1965 = vmatpush3.msra.mxu0 %v481_v49 }
 0x1f0   :  { %1966 = vmatprep.subr.mxu0 %v480_v50 }
 0x1f1   :  { %1967 = vmatpush3.msra.mxu0 %v480_v50 }
 0x1f2   :  { %1968 = vmatprep.subr.mxu0 %v479_v51 }
 0x1f3   :  { %1969 = vmatpush3.msra.mxu0 %v479_v51 }
 0x1f4   :  { %1970 = vmatprep.subr.mxu0 %v478_v52 }
 0x1f5   :  { %1971 = vmatpush3.msra.mxu0 %v478_v52 }
 0x1f6   :  { %1972 = vmatprep.subr.mxu0 %v477_v53 }
 0x1f7   :  { %1973 = vmatpush3.msra.mxu0 %v477_v53 }
 0x1f8   :  { %1974 = vmatprep.subr.mxu0 %v476_v54 }
 0x1f9   :  { %1975 = vmatpush3.msra.mxu0 %v476_v54  ;;  %v1656_v54 = vld [vmem:[%s2479_s4] ss:$0 sm:$0xff] }
 0x1fa   :  { %1976 = vmatprep.subr.mxu0 %v475_v55 }
 0x1fb   :  { %1977 = vmatpush3.msra.mxu0 %v475_v55 }
 0x1fc   :  { %1978 = vmatprep.subr.mxu0 %v474_v34 }
 0x1fd   :  { %1979 = vmatpush3.msra.mxu0 %v474_v34 }
 0x1fe   :  { %1980 = vmatprep.subr.mxu0 %v473_v35 }
 0x1ff   :  { %1981 = vmatpush3.msra.mxu0 %v473_v35 }
 0x200   :  { %1982 = vmatprep.subr.mxu0 %v472_v36 }
 0x201   :  { %1983 = vmatpush3.msra.mxu0 %v472_v36 }
 0x202   :  { %1984 = vmatprep.subr.mxu0 %v471_v37 }
 0x203   :  { %1985 = vmatpush3.msra.mxu0 %v471_v37  ;;  %v1102_v37 = vld [vmem:[#allocation9 + $0x418] sm:$0xff] }
 0x284   :  { %v1946_v56 = vpop.f32.mrf.mxu0 }
 0x285   :  { %v321_v57 = vmul.f32 2.0, %v1946_v56 }
 0x286   :  { %v311_v58 = vpop.f32.mrf.mxu0 }
 0x287   :  { %v2355_v59 = vsub.f32 %v321_v57, %v2326_v4  ;;  %v320_v60 = vmul.f32 2.0, %v311_v58  ;;  %v468_v4 = vld [vmem:[#allocation9 + $0x1e8] sm:$0xff] }
 0x289   :  { %v322_v61 = vsub.f32 %v320_v60, %v2329_v5  ;;  %1947 = vmatprep.subr.mxu1 %v2355_v59  ;;  %v467_v5 = vld [vmem:[#allocation9 + $0x1e0] sm:$0xff] }
 0x28a   :  { %1948 = vmatpush3.msra.mxu1 %v2355_v59 }
 0x28b   :  { %1949 = vmatprep.subr.mxu1 %v322_v61 }
 0x28c   :  { %1950 = vmatpush3.msra.mxu1 %v322_v61 }
 0x28d   :  { %1952 = vmatmul.mubr.msk.f32.vlgmr.msra.gmra.mxu1 %vm80_vm0, %v2316_v3  ;;  %1723 = vmatprep.subr.mxu1 %v470_v62 }
 0x28e   :  { %1724 = vmatpush3.msra.mxu1 %v454_v63  ;;  %641 = vmatprep.mubr.f32.mxu1 %v322_v61 }
 0x28f   :  { %1725 = vmatprep.subr.mxu1 %v469_v0 }
 0x290   :  { %1726 = vmatpush3.msra.mxu1 %v453_v1 }
 0x291   :  { %1727 = vmatprep.subr.mxu1 %v468_v4 }
 0x292   :  { %1728 = vmatpush3.msra.mxu1 %v452_v6  ;;  %v1114_v6 = vld [vmem:[#allocation9 + $0x478] sm:$0xff] }
 0x293   :  { %1729 = vmatprep.subr.mxu1 %v467_v5  ;;  %v1098_v5 = vld [vmem:[#allocation9 + $0x3f8] sm:$0xff]  ;;  %1833 = vmatprep.subr.mxu0 %v1114_v6 }
 0x294   :  { %1730 = vmatpush3.msra.mxu1 %v451_v7  ;;  %v1113_v7 = vld [vmem:[#allocation9 + $0x470] sm:$0xff]  ;;  %v1058_v6 = vld [vmem:[#allocation9 + $0x2b8] sm:$0xff] }
 0x295   :  { %1731 = vmatprep.subr.mxu1 %v466_v8  ;;  %v1097_v8 = vld [vmem:[#allocation9 + $0x3f0] sm:$0xff] }
 0x296   :  { %1732 = vmatpush3.msra.mxu1 %v450_v10  ;;  %v1112_v10 = vld [vmem:[#allocation9 + $0x468] sm:$0xff] }
 0x297   :  { %1733 = vmatprep.subr.mxu1 %v465_v12  ;;  %v1096_v12 = vld [vmem:[#allocation9 + $0x3e8] sm:$0xff] }
 0x298   :  { %1734 = vmatpush3.msra.mxu1 %v449_v13  ;;  %v1111_v13 = vld [vmem:[#allocation9 + $0x460] sm:$0xff] }
 0x299   :  { %1735 = vmatprep.subr.mxu1 %v464_v14  ;;  %v1095_v14 = vld [vmem:[#allocation9 + $0x3e0] sm:$0xff] }
 0x29a   :  { %1736 = vmatpush3.msra.mxu1 %v448_v15  ;;  %v1110_v15 = vld [vmem:[#allocation9 + $0x458] sm:$0xff] }
 0x29b   :  { %1737 = vmatprep.subr.mxu1 %v463_v16  ;;  %v1094_v16 = vld [vmem:[#allocation9 + $0x3d8] sm:$0xff] }
 0x29c   :  { %1738 = vmatpush3.msra.mxu1 %v447_v17  ;;  %v1109_v17 = vld [vmem:[#allocation9 + $0x450] sm:$0xff] }
 0x29d   :  { %1739 = vmatprep.subr.mxu1 %v462_v18  ;;  %v1093_v18 = vld [vmem:[#allocation9 + $0x3d0] sm:$0xff] }
 0x29e   :  { %1740 = vmatpush3.msra.mxu1 %v446_v19  ;;  %v1108_v19 = vld [vmem:[#allocation9 + $0x448] sm:$0xff] }
 0x29f   :  { %1741 = vmatprep.subr.mxu1 %v461_v20  ;;  %v1092_v20 = vld [vmem:[#allocation9 + $0x3c8] sm:$0xff] }
 0x2a0   :  { %1742 = vmatpush3.msra.mxu1 %v445_v21  ;;  %v1107_v21 = vld [vmem:[#allocation9 + $0x440] sm:$0xff] }
 0x2a1   :  { %1743 = vmatprep.subr.mxu1 %v460_v22  ;;  %v1091_v22 = vld [vmem:[#allocation9 + $0x3c0] sm:$0xff] }
 0x2a2   :  { %1744 = vmatpush3.msra.mxu1 %v444_v23  ;;  %v1106_v23 = vld [vmem:[#allocation9 + $0x438] sm:$0xff] }
 0x2a3   :  { %1745 = vmatprep.subr.mxu1 %v459_v24  ;;  %v1090_v24 = vld [vmem:[#allocation9 + $0x3b8] sm:$0xff] }
 0x2a4   :  { %1746 = vmatpush3.msra.mxu1 %v443_v25  ;;  %v1717_v44 = vpop.f32.mrf.mxu0  ;;  %v1105_v25 = vld [vmem:[#allocation9 + $0x430] sm:$0xff] }
 0x2a5   :  { %1747 = vmatprep.subr.mxu1 %v458_v26  ;;  %v1089_v26 = vld [vmem:[#allocation9 + $0x3b0] sm:$0xff] }
 0x2a6   :  { %1748 = vmatpush3.msra.mxu1 %v442_v27  ;;  %v1718_v45 = vpop.f32.mrf.mxu0  ;;  %v1104_v27 = vld [vmem:[#allocation9 + $0x428] sm:$0xff] }
 0x2a7   :  { %1749 = vmatprep.subr.mxu1 %v457_v28  ;;  %v1719_v53 = vadd.f32 %v1718_v45, %v1717_v44  ;;  %v1088_v28 = vld [vmem:[#allocation9 + $0x3a8] sm:$0xff]  ;;  %v1083_v44 = vld [vmem:[#allocation9 + $0x380] sm:$0xff] }
 0x2a8   :  { %1750 = vmatpush3.msra.mxu1 %v441_v29  ;;  %v1720_v47 = vpop.f32.mrf.mxu0  ;;  %v1103_v29 = vld [vmem:[#allocation9 + $0x420] sm:$0xff] }
 0x2a9   :  { %1751 = vmatprep.subr.mxu1 %v456_v30  ;;  %v569_v56 = vadd.f32 %v1719_v53, %v1656_v54  ;;  %v1087_v30 = vld [vmem:[#allocation9 + $0x3a0] sm:$0xff]  ;;  %v1065_v53 = vld [vmem:[#allocation9 + $0x2f0] sm:$0xff] }
 0x2aa   :  { %1752 = vmatpush3.msra.mxu1 %v440_v31  ;;  %v1721_v49 = vpop.f32.mrf.mxu0 }
 0x2ab   :  { %1753 = vmatprep.subr.mxu1 %v455_v32  ;;  %v1722_v51 = vadd.f32 %v1721_v49, %v1720_v47 }
 0x2ac   :  { %1754 = vmatpush3.msra.mxu1 %v439_v33 }
 0x2ad   :  { %642 = vmatmul.mubr.f32.vlgmr.msra.gmra.mxu1 %v2342_v11  ;;  %v574_v55 = vadd.f32 %v1722_v51, %v1656_v54  ;;  %v1066_v51 = vld [vmem:[#allocation9 + $0x2f8] sm:$0xff]  ;;  %v1080_v54 = vld [vmem:[#allocation9 + $0x368] sm:$0xff] }
 0x2ae   :  { %646 = vmatprep.mubr.f32.mxu1 %v2355_v59 }
 0x2b1   :  { %647 = vmatmul.mubr.f32.gmra.mxu1 %v2339_v9 }
 0x2b2   :  { %1993 = vmatprep.mubr.msk.f32.mxu1 %vm80_vm0, %v2310_v2 }
 0x34d   :  { %v1953_v38 = vpop.f32.mrf.mxu1 }
 0x34e   :  { %v402_v39 = vmul.f32 2.0, %v1953_v38  ;;  %v1086_v38 = vld [vmem:[#allocation9 + $0x398] sm:$0xff] }
 0x34f   :  { %v392_v40 = vpop.f32.mrf.mxu1 }
 0x350   :  { %v401_v41 = vmul.f32 2.0, %v392_v40  ;;  %v404_v43 = vsub.f32 %v402_v39, %v2339_v9  ;;  %v1101_v39 = vld [vmem:[#allocation9 + $0x410] sm:$0xff] }
 0x351   :  { %v1085_v40 = vld [vmem:[#allocation9 + $0x390] sm:$0xff] }
 0x352   :  { %v403_v42 = vsub.f32 %v401_v41, %v2342_v11  ;;  %v1100_v41 = vld [vmem:[#allocation9 + $0x408] sm:$0xff] }
 0x354   :  { %1986 = vmatprep.mubr.f32.mxu0 %v403_v42  ;;  %v1084_v42 = vld [vmem:[#allocation9 + $0x388] sm:$0xff] }
 0x355   :  { %1987 = vmatmul.mubr.f32.vlgmr.msra.gmra.mxu0 %v404_v43  ;;  %v1099_v43 = vld [vmem:[#allocation9 + $0x400] sm:$0xff] }
 0x356   :  { %1834 = vmatpush3.msra.mxu0 %v1098_v5  ;;  %v1073_v5 = vld [vmem:[#allocation9 + $0x330] sm:$0xff] }
 0x357   :  { %1835 = vmatprep.subr.mxu0 %v1113_v7  ;;  %v1057_v7 = vld [vmem:[#allocation9 + $0x2b0] sm:$0xff] }
 0x358   :  { %1836 = vmatpush3.msra.mxu0 %v1097_v8  ;;  %v1072_v8 = vld [vmem:[#allocation9 + $0x328] sm:$0xff] }
 0x359   :  { %1837 = vmatprep.subr.mxu0 %v1112_v10  ;;  %v1056_v10 = vld [vmem:[#allocation9 + $0x2a8] sm:$0xff] }
 0x35a   :  { %1838 = vmatpush3.msra.mxu0 %v1096_v12  ;;  %v1071_v12 = vld [vmem:[#allocation9 + $0x320] sm:$0xff] }
 0x35b   :  { %1839 = vmatprep.subr.mxu0 %v1111_v13  ;;  %v1055_v13 = vld [vmem:[#allocation9 + $0x2a0] sm:$0xff] }
 0x35c   :  { %1840 = vmatpush3.msra.mxu0 %v1095_v14  ;;  %v1070_v14 = vld [vmem:[#allocation9 + $0x318] sm:$0xff] }
 0x35d   :  { %1841 = vmatprep.subr.mxu0 %v1110_v15  ;;  %v1054_v15 = vld [vmem:[#allocation9 + $0x298] sm:$0xff] }
 0x35e   :  { %1842 = vmatpush3.msra.mxu0 %v1094_v16  ;;  %v1069_v16 = vld [vmem:[#allocation9 + $0x310] sm:$0xff] }
 0x35f   :  { %1843 = vmatprep.subr.mxu0 %v1109_v17  ;;  %v1053_v17 = vld [vmem:[#allocation9 + $0x290] sm:$0xff] }
 0x360   :  { %1844 = vmatpush3.msra.mxu0 %v1093_v18  ;;  %v1068_v18 = vld [vmem:[#allocation9 + $0x308] sm:$0xff] }
 0x361   :  { %1845 = vmatprep.subr.mxu0 %v1108_v19  ;;  %v1052_v19 = vld [vmem:[#allocation9 + $0x288] sm:$0xff] }
 0x362   :  { %1846 = vmatpush3.msra.mxu0 %v1092_v20  ;;  %v1067_v20 = vld [vmem:[#allocation9 + $0x300] sm:$0xff] }
 0x363   :  { %1847 = vmatprep.subr.mxu0 %v1107_v21  ;;  %v1051_v21 = vld [vmem:[#allocation9 + $0x280] sm:$0xff] }
 0x364   :  { %1848 = vmatpush3.msra.mxu0 %v1091_v22  ;;  %v1130_v22 = vld [vmem:[#allocation9 + $0x4f8] sm:$0xff] }
 0x365   :  { %1849 = vmatprep.subr.mxu0 %v1106_v23  ;;  %v1129_v23 = vld [vmem:[#allocation9 + $0x4f0] sm:$0xff] }
 0x366   :  { %1850 = vmatpush3.msra.mxu0 %v1090_v24  ;;  %v1128_v24 = vld [vmem:[#allocation9 + $0x4e8] sm:$0xff] }
 0x367   :  { %1851 = vmatprep.subr.mxu0 %v1105_v25  ;;  %v1127_v25 = vld [vmem:[#allocation9 + $0x4e0] sm:$0xff] }
 0x368   :  { %1852 = vmatpush3.msra.mxu0 %v1089_v26  ;;  %v1126_v26 = vld [vmem:[#allocation9 + $0x4d8] sm:$0xff] }
 0x369   :  { %1853 = vmatprep.subr.mxu0 %v1104_v27  ;;  %v1125_v27 = vld [vmem:[#allocation9 + $0x4d0] sm:$0xff] }
 0x36a   :  { %1854 = vmatpush3.msra.mxu0 %v1088_v28  ;;  %v1124_v28 = vld [vmem:[#allocation9 + $0x4c8] sm:$0xff] }
 0x36b   :  { %1855 = vmatprep.subr.mxu0 %v1103_v29  ;;  %v1121_v29 = vld [vmem:[#allocation9 + $0x4b0] sm:$0xff] }
 0x36c   :  { %1856 = vmatpush3.msra.mxu0 %v1087_v30  ;;  %v1119_v30 = vld [vmem:[#allocation9 + $0x4a0] sm:$0xff] }
 0x36d   :  { %v1755_v46 = vpop.f32.mrf.mxu1  ;;  %1857 = vmatprep.subr.mxu0 %v1102_v37 }
 0x36e   :  { %1858 = vmatpush3.msra.mxu0 %v1086_v38 }
 0x36f   :  { %v1756_v48 = vpop.f32.mrf.mxu1  ;;  %1859 = vmatprep.subr.mxu0 %v1101_v39 }
 0x370   :  { %v1757_v9 = vadd.f32 %v1756_v48, %v1755_v46  ;;  %1860 = vmatpush3.msra.mxu0 %v1085_v40 }
 0x371   :  { %v1758_v50 = vpop.f32.mrf.mxu1  ;;  %1861 = vmatprep.subr.mxu0 %v1100_v41 }
 0x372   :  { %v644_v60 = vadd.f32 %v1757_v9, %v569_v56  ;;  %1862 = vmatpush3.msra.mxu0 %v1084_v42  ;;  %v1063_v56 = vld [vmem:[#allocation9 + $0x2e0] sm:$0xff]  ;;  %v1078_v9 = vld [vmem:[#allocation9 + $0x358] sm:$0xff] }
 0x373   :  { %v1759_v52 = vpop.f32.mrf.mxu1  ;;  %1863 = vmatprep.subr.mxu0 %v1099_v43  ;;  %v2252_v43 = vmov 0.0  }
 0x374   :  { %v1760_v11 = vadd.f32 %v1759_v52, %v1758_v50  ;;  %1864 = vmatpush3.msra.mxu0 %v1083_v44  ;;  %v1082_v50 = vld [vmem:[#allocation9 + $0x378] sm:$0xff]  ;;  %v1081_v52 = vld [vmem:[#allocation9 + $0x370] sm:$0xff] }
 0x375   :  { %2052 = vmatprep.subr.mxu0 %v2252_v43 }
 0x376   :  { %v649_v57 = vadd.f32 %v1760_v11, %v574_v55  ;;  %v1064_v55 = vld [vmem:[#allocation9 + $0x2e8] sm:$0xff]  ;;  %v1079_v11 = vld [vmem:[#allocation9 + $0x360] sm:$0xff] }
 0x415   :  { %v1988_v58 = vpop.f32.mrf.mxu0 }
 0x416   :  { %v724_v59 = vadd.f32 %v1988_v58, %v649_v57  ;;  %v1062_v57 = vld [vmem:[#allocation9 + $0x2d8] sm:$0xff]  ;;  %v1061_v58 = vld [vmem:[#allocation9 + $0x2d0] sm:$0xff] }
 0x417   :  { %v718_v61 = vpop.f32.mrf.mxu0 }
 0x418   :  { %v2372_v62 = vmax.f32 %v724_v59, 0.0  ;;  %v719_v63 = vadd.f32 %v718_v61, %v644_v60  ;;  %v1076_v59 = vld [vmem:[#allocation9 + $0x348] sm:$0xff]  ;;  %v1075_v61 = vld [vmem:[#allocation9 + $0x340] sm:$0xff] }
 0x419   :  { %v1060_v60 = vld [vmem:[#allocation9 + $0x2c8] sm:$0xff] }
 0x41a   :  { %v2374_v0 = vmax.f32 %v719_v63, 0.0  ;;  %1989 = vmatprep.subr.mxu1 %v2372_v62  ;;  %v1059_v63 = vld [vmem:[#allocation9 + $0x2c0] sm:$0xff] }
 0x41b   :  { %1990 = vmatpush3.msra.mxu1 %v2372_v62 }
 0x41c   :  { %1991 = vmatprep.subr.mxu1 %v2374_v0 }
 0x41d   :  { %1992 = vmatpush3.msra.mxu1 %v2374_v0 }
 0x41e   :  { %1994 = vmatmul.mubr.msk.f32.vlgmr.msra.gmra.mxu1 %vm80_vm0, %v2316_v3 }
 0x41f   :  { %2000 = vmatprep.mubr.msk.f32.mxu1 %vm80_vm0, %v2310_v2 }
 0x4de   :  { %v2384_v1 = vpop.f32.mrf.mxu1 }
 0x4df   :  { %1996 = vmatprep.subr.mxu1 %v2384_v1 }
 0x4e0   :  { %v2387_v4 = vpop.f32.mrf.mxu1  ;;  %1997 = vmatpush3.msra.mxu1 %v2384_v1 }
 0x4e1   :  { %1998 = vmatprep.subr.mxu1 %v2387_v4 }
 0x4e2   :  { %1999 = vmatpush3.msra.mxu1 %v2387_v4 }
 0x4e3   :  { %2001 = vmatmul.mubr.msk.f32.vlgmr.msra.gmra.mxu1 %vm80_vm0, %v2316_v3 }
 0x4e4   :  { %2007 = vmatprep.mubr.msk.f32.mxu1 %vm80_vm0, %v2310_v2 }
 0x5a3   :  { %v2002_v31 = vpop.f32.mrf.mxu1 }
 0x5a4   :  { %v884_v32 = vmul.f32 2.0, %v2002_v31  ;;  %v1118_v31 = vld [vmem:[#allocation9 + $0x498] sm:$0xff] }
 0x5a5   :  { %v874_v33 = vpop.f32.mrf.mxu1 }
 0x5a6   :  { %v2397_v34 = vsub.f32 %v884_v32, %v2372_v62  ;;  %v883_v35 = vmul.f32 2.0, %v874_v33  ;;  %v1117_v32 = vld [vmem:[#allocation9 + $0x490] sm:$0xff]  ;;  %v1116_v33 = vld [vmem:[#allocation9 + $0x488] sm:$0xff] }
 0x5a8   :  { %v2400_v36 = vsub.f32 %v883_v35, %v2374_v0  ;;  %2003 = vmatprep.subr.mxu1 %v2397_v34  ;;  %v1115_v35 = vld [vmem:[#allocation9 + $0x480] sm:$0xff] }
 0x5a9   :  { %2004 = vmatpush3.msra.mxu1 %v2397_v34 }
 0x5aa   :  { %2005 = vmatprep.subr.mxu1 %v2400_v36 }
 0x5ab   :  { %2006 = vmatpush3.msra.mxu1 %v2400_v36 }
 0x5ac   :  { %2008 = vmatmul.mubr.msk.f32.vlgmr.msra.gmra.mxu1 %vm80_vm0, %v2316_v3 }
 0x5ad   :  { %2014 = vmatprep.mubr.msk.f32.mxu1 %vm80_vm0, %v2310_v2 }
 0x66c   :  { %v2009_v45 = vpop.f32.mrf.mxu1 }
 0x66d   :  { %v965_v46 = vmul.f32 2.0, %v2009_v45 }
 0x66e   :  { %v955_v47 = vpop.f32.mrf.mxu1 }
 0x66f   :  { %v967_v2 = vsub.f32 %v965_v46, %v2384_v1  ;;  %v964_v48 = vmul.f32 2.0, %v955_v47 }
 0x671   :  { %v966_v49 = vsub.f32 %v964_v48, %v2387_v4  ;;  %2010 = vmatprep.subr.mxu1 %v967_v2 }
 0x672   :  { %2011 = vmatpush3.msra.mxu1 %v967_v2 }
 0x673   :  { %2012 = vmatprep.subr.mxu1 %v966_v49  ;;  %1285 = vmatprep.mubr.f32.mxu0 %v966_v49 }
 0x674   :  { %2013 = vmatpush3.msra.mxu1 %v966_v49  ;;  %1286 = vmatmul.mubr.f32.vlgmr.msra.gmra.mxu0 %v2400_v36 }
 0x675   :  { %2015 = vmatmul.mubr.msk.f32.vlgmr.msra.gmra.mxu1 %vm80_vm0, %v2316_v3  ;;  %1795 = vmatprep.subr.mxu1 %v1082_v50  ;;  %v1077_v3 = vld [vmem:[#allocation9 + $0x350] sm:$0xff] }
 0x676   :  { %1290 = vmatprep.mubr.f32.mxu0 %v967_v2  ;;  %1796 = vmatpush3.msra.mxu1 %v1066_v51  ;;  %v1665_v51 = vld [vmem:[%s2479_s4 + $0x1] ss:$0 sm:$0xff] }
 0x677   :  { %1210 = vmatprep.mubr.f32.mxu1 %v2387_v4  ;;  %1797 = vmatprep.subr.mxu1 %v1081_v52  ;;  %v1074_v4 = vld [vmem:[#allocation9 + $0x338] sm:$0xff] }
 0x678   :  { %1798 = vmatpush3.msra.mxu1 %v1065_v53  ;;  %1291 = vmatmul.mubr.f32.gmra.mxu0 %v2397_v34 }
 0x679   :  { %1799 = vmatprep.subr.mxu1 %v1080_v54  ;;  %2056 = vmatprep.mubr.msk.f32.mxu0 %vm2253_vm1, %v2252_v43 }
 0x67a   :  { %1800 = vmatpush3.msra.mxu1 %v1064_v55 }
 0x67b   :  { %1801 = vmatprep.subr.mxu1 %v1079_v11 }
 0x67c   :  { %1802 = vmatpush3.msra.mxu1 %v1063_v56 }
 0x67d   :  { %1803 = vmatprep.subr.mxu1 %v1078_v9 }
 0x67e   :  { %1804 = vmatpush3.msra.mxu1 %v1062_v57 }
 0x67f   :  { %1805 = vmatprep.subr.mxu1 %v1077_v3 }
 0x680   :  { %1806 = vmatpush3.msra.mxu1 %v1061_v58 }
 0x681   :  { %1807 = vmatprep.subr.mxu1 %v1076_v59 }
 0x682   :  { %1808 = vmatpush3.msra.mxu1 %v1060_v60 }
 0x683   :  { %1809 = vmatprep.subr.mxu1 %v1075_v61  ;;  %v1373_v61 = vld [vmem:[#allocation8] sm:$0xff] }
 0x684   :  { %1810 = vmatpush3.msra.mxu1 %v1059_v63  ;;  %v1462_v63 = vld [vmem:[#allocation9 + $0x578] sm:$0xff] }
 0x685   :  { %1811 = vmatprep.subr.mxu1 %v1074_v4  ;;  %v1461_v4 = vld [vmem:[#allocation9 + $0x570] sm:$0xff] }
 0x686   :  { %1812 = vmatpush3.msra.mxu1 %v1058_v6  ;;  %v1460_v6 = vld [vmem:[#allocation9 + $0x568] sm:$0xff] }
 0x687   :  { %1813 = vmatprep.subr.mxu1 %v1073_v5  ;;  %v1459_v5 = vld [vmem:[#allocation9 + $0x560] sm:$0xff] }
 0x688   :  { %1814 = vmatpush3.msra.mxu1 %v1057_v7  ;;  %v1458_v7 = vld [vmem:[#allocation9 + $0x558] sm:$0xff] }
 0x689   :  { %1815 = vmatprep.subr.mxu1 %v1072_v8  ;;  %v1457_v8 = vld [vmem:[#allocation9 + $0x550] sm:$0xff] }
 0x68a   :  { %1816 = vmatpush3.msra.mxu1 %v1056_v10  ;;  %v1456_v10 = vld [vmem:[#allocation9 + $0x548] sm:$0xff] }
 0x68b   :  { %1817 = vmatprep.subr.mxu1 %v1071_v12  ;;  %v1455_v12 = vld [vmem:[#allocation9 + $0x540] sm:$0xff] }
 0x68c   :  { %1818 = vmatpush3.msra.mxu1 %v1055_v13  ;;  %v1454_v13 = vld [vmem:[#allocation9 + $0x538] sm:$0xff] }
 0x68d   :  { %1819 = vmatprep.subr.mxu1 %v1070_v14  ;;  %v1453_v14 = vld [vmem:[#allocation9 + $0x530] sm:$0xff] }
 0x68e   :  { %1820 = vmatpush3.msra.mxu1 %v1054_v15  ;;  %v1452_v15 = vld [vmem:[#allocation9 + $0x528] sm:$0xff] }
 0x68f   :  { %1821 = vmatprep.subr.mxu1 %v1069_v16  ;;  %v1451_v16 = vld [vmem:[#allocation9 + $0x520] sm:$0xff] }
 0x690   :  { %1822 = vmatpush3.msra.mxu1 %v1053_v17  ;;  %v1450_v17 = vld [vmem:[#allocation9 + $0x518] sm:$0xff] }
 0x691   :  { %1823 = vmatprep.subr.mxu1 %v1068_v18  ;;  %v1449_v18 = vld [vmem:[#allocation9 + $0x510] sm:$0xff] }
 0x692   :  { %1824 = vmatpush3.msra.mxu1 %v1052_v19  ;;  %v1448_v19 = vld [vmem:[#allocation9 + $0x508] sm:$0xff] }
 0x693   :  { %1825 = vmatprep.subr.mxu1 %v1067_v20  ;;  %v1447_v20 = vld [vmem:[#allocation9 + $0x500] sm:$0xff] }
 0x694   :  { %1826 = vmatpush3.msra.mxu1 %v1051_v21  ;;  %v1554_v21 = vld [vmem:[#allocation9 + $0x5f8] sm:$0xff] }
 0x695   :  { %1211 = vmatmul.mubr.f32.vlgmr.msra.gmra.mxu1 %v2374_v0  ;;  %2017 = vmatprep.subr.mxu1 %v1130_v22  ;;  %v1123_v0 = vld [vmem:[#allocation9 + $0x4c0] sm:$0xff] }
 0x696   :  { %1215 = vmatprep.mubr.f32.mxu1 %v2384_v1  ;;  %2018 = vmatpush3.msra.mxu1 %v1130_v22  ;;  %v1122_v1 = vld [vmem:[#allocation9 + $0x4b8] sm:$0xff]  ;;  %v1553_v22 = vld [vmem:[#allocation9 + $0x5f0] sm:$0xff] }
 0x697   :  { %2019 = vmatprep.subr.mxu1 %v1129_v23 }
 0x698   :  { %2020 = vmatpush3.msra.mxu1 %v1129_v23  ;;  %v1552_v23 = vld [vmem:[#allocation9 + $0x5e8] sm:$0xff] }
 0x699   :  { %1216 = vmatmul.mubr.f32.gmra.mxu1 %v2372_v62  ;;  %2021 = vmatprep.subr.mxu1 %v1128_v24  ;;  %v1120_v62 = vld [vmem:[#allocation9 + $0x4a8] sm:$0xff] }
 0x69a   :  { %2022 = vmatpush3.msra.mxu1 %v1128_v24  ;;  %v1551_v24 = vld [vmem:[#allocation9 + $0x5e0] sm:$0xff] }
 0x69b   :  { %2023 = vmatprep.subr.mxu1 %v1127_v25 }
 0x69c   :  { %2024 = vmatpush3.msra.mxu1 %v1127_v25  ;;  %v1550_v25 = vld [vmem:[#allocation9 + $0x5d8] sm:$0xff] }
 0x69d   :  { %2025 = vmatprep.subr.mxu1 %v1126_v26 }
 0x69e   :  { %2026 = vmatpush3.msra.mxu1 %v1126_v26  ;;  %v1549_v26 = vld [vmem:[#allocation9 + $0x5d0] sm:$0xff] }
 0x69f   :  { %2027 = vmatprep.subr.mxu1 %v1125_v27 }
 0x6a0   :  { %2028 = vmatpush3.msra.mxu1 %v1125_v27  ;;  %v1548_v27 = vld [vmem:[#allocation9 + $0x5c8] sm:$0xff] }
 0x6a1   :  { %2029 = vmatprep.subr.mxu1 %v1124_v28 }
 0x6a2   :  { %2030 = vmatpush3.msra.mxu1 %v1124_v28  ;;  %v1547_v28 = vld [vmem:[#allocation9 + $0x5c0] sm:$0xff] }
 0x6a3   :  { %2031 = vmatprep.subr.mxu1 %v1123_v0 }
 0x6a4   :  { %2032 = vmatpush3.msra.mxu1 %v1123_v0  ;;  %v1546_v0 = vld [vmem:[#allocation9 + $0x5b8] sm:$0xff] }
 0x6a5   :  { %2033 = vmatprep.subr.mxu1 %v1122_v1 }
 0x6a6   :  { %2034 = vmatpush3.msra.mxu1 %v1122_v1  ;;  %v1545_v1 = vld [vmem:[#allocation9 + $0x5b0] sm:$0xff] }
 0x6a7   :  { %2035 = vmatprep.subr.mxu1 %v1121_v29 }
 0x6a8   :  { %2036 = vmatpush3.msra.mxu1 %v1121_v29  ;;  %v1544_v29 = vld [vmem:[#allocation9 + $0x5a8] sm:$0xff] }
 0x6a9   :  { %2037 = vmatprep.subr.mxu1 %v1120_v62 }
 0x6aa   :  { %2038 = vmatpush3.msra.mxu1 %v1120_v62  ;;  %v1543_v62 = vld [vmem:[#allocation9 + $0x5a0] sm:$0xff] }
 0x6ab   :  { %2039 = vmatprep.subr.mxu1 %v1119_v30 }
 0x6ac   :  { %2040 = vmatpush3.msra.mxu1 %v1119_v30  ;;  %v1542_v30 = vld [vmem:[#allocation9 + $0x598] sm:$0xff] }
 0x6ad   :  { %2041 = vmatprep.subr.mxu1 %v1118_v31 }
 0x6ae   :  { %2042 = vmatpush3.msra.mxu1 %v1118_v31 }
 0x6af   :  { %2043 = vmatprep.subr.mxu1 %v1117_v32 }
 0x6b0   :  { %2044 = vmatpush3.msra.mxu1 %v1117_v32 }
 0x6b1   :  { %2045 = vmatprep.subr.mxu1 %v1116_v33 }
 0x6b2   :  { %2046 = vmatpush3.msra.mxu1 %v1116_v33  ;;  %v1541_v33 = vld [vmem:[#allocation9 + $0x590] sm:$0xff] }
 0x6b3   :  { %2047 = vmatprep.subr.mxu1 %v1115_v35 }
 0x6b4   :  { %2048 = vmatpush3.msra.mxu1 %v1115_v35  ;;  %v1540_v35 = vld [vmem:[#allocation9 + $0x588] sm:$0xff] }
 0x6b5   :  { %2094 = vmatprep.subr.mxu1 %v2252_v43 }
 0x734   :  { %v1865_v46 = vpop.f32.mrf.mxu0 }
 0x735   :  { %v2016_v37 = vpop.f32.mrf.mxu1 }
 0x736   :  { %v1046_v38 = vmul.f32 2.0, %v2016_v37  ;;  %v1866_v47 = vpop.f32.mrf.mxu0  ;;  %v1539_v37 = vld [vmem:[#allocation9 + $0x580] sm:$0xff] }
 0x737   :  { %v1036_v39 = vpop.f32.mrf.mxu1  ;;  %v1867_v55 = vadd.f32 %v1866_v47, %v1865_v46 }
 0x738   :  { %v1045_v40 = vmul.f32 2.0, %v1036_v39  ;;  %v1048_v42 = vsub.f32 %v1046_v38, %v2397_v34  ;;  %v1868_v2 = vpop.f32.mrf.mxu0  ;;  %v1667_v38 = vld [vmem:[%s2479_s4 + $0x2] ss:$0 sm:$0xff] }
 0x73a   :  { %v1047_v41 = vsub.f32 %v1045_v40, %v2400_v36  ;;  %v1869_v50 = vpop.f32.mrf.mxu0 }
 0x73b   :  { %v1870_v53 = vadd.f32 %v1869_v50, %v1868_v2 }
 0x73c   :  { %2049 = vmatprep.mubr.f32.mxu1 %v1047_v41 }
 0x73d   :  { %2050 = vmatmul.mubr.f32.vlgmr.msra.gmra.mxu1 %v1048_v42 }
 0x73e   :  { %2126 = vmatprep.mubr.msk.f32.mxu1 %vm2253_vm1, %v2252_v43  ;;  %2095 = vmatpush3.msra.mxu1 %v1554_v21 }
 0x73f   :  { %2096 = vmatprep.subr.mxu1 %v2252_v43 }
 0x740   :  { %2097 = vmatpush3.msra.mxu1 %v1553_v22 }
 0x741   :  { %2098 = vmatprep.subr.mxu1 %v2252_v43 }
 0x742   :  { %2099 = vmatpush3.msra.mxu1 %v1552_v23 }
 0x743   :  { %2100 = vmatprep.subr.mxu1 %v2252_v43 }
 0x744   :  { %2101 = vmatpush3.msra.mxu1 %v1551_v24 }
 0x745   :  { %2102 = vmatprep.subr.mxu1 %v2252_v43 }
 0x746   :  { %2103 = vmatpush3.msra.mxu1 %v1550_v25 }
 0x747   :  { %2104 = vmatprep.subr.mxu1 %v2252_v43 }
 0x748   :  { %2105 = vmatpush3.msra.mxu1 %v1549_v26 }
 0x749   :  { %2106 = vmatprep.subr.mxu1 %v2252_v43 }
 0x74a   :  { %2107 = vmatpush3.msra.mxu1 %v1548_v27 }
 0x74b   :  { %2108 = vmatprep.subr.mxu1 %v2252_v43 }
 0x74c   :  { %2109 = vmatpush3.msra.mxu1 %v1547_v28 }
 0x74d   :  { %2110 = vmatprep.subr.mxu1 %v2252_v43 }
 0x74e   :  { %2111 = vmatpush3.msra.mxu1 %v1546_v0 }
 0x74f   :  { %2112 = vmatprep.subr.mxu1 %v2252_v43 }
 0x750   :  { %2113 = vmatpush3.msra.mxu1 %v1545_v1 }
 0x751   :  { %2114 = vmatprep.subr.mxu1 %v2252_v43 }
 0x752   :  { %2115 = vmatpush3.msra.mxu1 %v1544_v29 }
 0x753   :  { %2116 = vmatprep.subr.mxu1 %v2252_v43 }
 0x754   :  { %2117 = vmatpush3.msra.mxu1 %v1543_v62 }
 0x755   :  { %v1827_v44 = vpop.f32.mrf.mxu1  ;;  %2118 = vmatprep.subr.mxu1 %v2252_v43 }
 0x756   :  { %2119 = vmatpush3.msra.mxu1 %v1542_v30 }
 0x757   :  { %v1828_v45 = vpop.f32.mrf.mxu1  ;;  %2120 = vmatprep.subr.mxu1 %v2252_v43 }
 0x758   :  { %v1829_v49 = vadd.f32 %v1828_v45, %v1827_v44  ;;  %2121 = vmatpush3.msra.mxu1 %v1541_v33  ;;  %v1668_v44 = vld [vmem:[%s2479_s4 + $0x3] ss:$0 sm:$0xff] }
 0x759   :  { %v1830_v36 = vpop.f32.mrf.mxu1  ;;  %2122 = vmatprep.subr.mxu1 %v2252_v43 }
 0x75a   :  { %v1213_v54 = vadd.f32 %v1829_v49, %v1665_v51  ;;  %2123 = vmatpush3.msra.mxu1 %v1540_v35 }
 0x75b   :  { %v1831_v34 = vpop.f32.mrf.mxu1  ;;  %2124 = vmatprep.subr.mxu1 %v2252_v43 }
 0x75c   :  { %v1832_v48 = vadd.f32 %v1831_v34, %v1830_v36  ;;  %v1288_v57 = vadd.f32 %v1867_v55, %v1213_v54  ;;  %2125 = vmatpush3.msra.mxu1 %v1539_v37 }
 0x75e   :  { %v1218_v52 = vadd.f32 %v1832_v48, %v1665_v51 }
 0x760   :  { %v1293_v11 = vadd.f32 %v1870_v53, %v1218_v52 }
 0x7fd   :  { %v2051_v56 = vpop.f32.mrf.mxu1 }
 0x7fe   :  { %v1368_v9 = vadd.f32 %v2051_v56, %v1293_v11 }
 0x7ff   :  { %v1362_v3 = vpop.f32.mrf.mxu1 }
 0x800   :  { %v1372_v58 = vmax.f32 %v1368_v9, 0.0  ;;  %v1363_v59 = vadd.f32 %v1362_v3, %v1288_v57 }
 0x802   :  { %v1371_v60 = vmax.f32 %v1363_v59, 0.0  ;;  %2053 = vmatpush3.msra.mxu0 %v1372_v58 }
 0x803   :  { %2054 = vmatprep.subr.mxu0 %v2252_v43 }
 0x804   :  { %2055 = vmatpush3.msra.mxu0 %v1371_v60 }
 0x805   :  { %2057 = vmatmul.mubr.msk.f32.vlgmr.msra.gmra.mxu0 %vm80_vm0, %v1373_v61  ;;  %2059 = vmatprep.subr.mxu0 %v2252_v43 }
 0x806   :  { %2060 = vmatpush3.msra.mxu0 %v1462_v63  ;;  %2091 = vmatprep.mubr.msk.f32.mxu0 %vm2253_vm1, %v2252_v43 }
 0x807   :  { %2061 = vmatprep.subr.mxu0 %v2252_v43 }
 0x808   :  { %2062 = vmatpush3.msra.mxu0 %v1461_v4 }
 0x809   :  { %2063 = vmatprep.subr.mxu0 %v2252_v43 }
 0x80a   :  { %2064 = vmatpush3.msra.mxu0 %v1460_v6 }
 0x80b   :  { %2065 = vmatprep.subr.mxu0 %v2252_v43 }
 0x80c   :  { %2066 = vmatpush3.msra.mxu0 %v1459_v5 }
 0x80d   :  { %2067 = vmatprep.subr.mxu0 %v2252_v43 }
 0x80e   :  { %2068 = vmatpush3.msra.mxu0 %v1458_v7 }
 0x80f   :  { %2069 = vmatprep.subr.mxu0 %v2252_v43 }
 0x810   :  { %2070 = vmatpush3.msra.mxu0 %v1457_v8 }
 0x811   :  { %2071 = vmatprep.subr.mxu0 %v2252_v43 }
 0x812   :  { %2072 = vmatpush3.msra.mxu0 %v1456_v10 }
 0x813   :  { %2073 = vmatprep.subr.mxu0 %v2252_v43 }
 0x814   :  { %2074 = vmatpush3.msra.mxu0 %v1455_v12 }
 0x815   :  { %2075 = vmatprep.subr.mxu0 %v2252_v43 }
 0x816   :  { %2076 = vmatpush3.msra.mxu0 %v1454_v13 }
 0x817   :  { %2077 = vmatprep.subr.mxu0 %v2252_v43 }
 0x818   :  { %2078 = vmatpush3.msra.mxu0 %v1453_v14 }
 0x819   :  { %2079 = vmatprep.subr.mxu0 %v2252_v43 }
 0x81a   :  { %2080 = vmatpush3.msra.mxu0 %v1452_v15 }
 0x81b   :  { %2081 = vmatprep.subr.mxu0 %v2252_v43 }
 0x81c   :  { %2082 = vmatpush3.msra.mxu0 %v1451_v16 }
 0x81d   :  { %2083 = vmatprep.subr.mxu0 %v2252_v43 }
 0x81e   :  { %2084 = vmatpush3.msra.mxu0 %v1450_v17 }
 0x81f   :  { %2085 = vmatprep.subr.mxu0 %v2252_v43 }
 0x820   :  { %2086 = vmatpush3.msra.mxu0 %v1449_v18 }
 0x821   :  { %2087 = vmatprep.subr.mxu0 %v2252_v43 }
 0x822   :  { %2088 = vmatpush3.msra.mxu0 %v1448_v19 }
 0x823   :  { %2089 = vmatprep.subr.mxu0 %v2252_v43 }
 0x824   :  { %2090 = vmatpush3.msra.mxu0 %v1447_v20 }
 0x8c5   :  { %v1443_v31 = vpop.f32.mrf.mxu0 }
 0x8c6   :  { %2092 = vmatmul.mubr.f32.vlgmr.msra.gmra.mxu0 %v1443_v31 }
 0x8c7   :  { %v2058_v32 = vpop.f32.mrf.mxu0 }
 0x986   :  { %v1534_v39 = vpop.f32.mrf.mxu0 }
 0x987   :  { %v1535_v40 = vadd.f32 %v1667_v38, %v1534_v39 }
 0x988   :  { %v2093_v41 = vpop.f32.mrf.mxu0 }
 0x989   :  { %v1538_v42 = vmax.f32 %v1535_v40, 0.0 }
 0x98b   :  { %2127 = vmatmul.mubr.f32.vlgmr.msra.gmra.mxu1 %v1538_v42 }
 0xa4b   :  { %v1626_v45 = vpop.f32.mrf.mxu1 }
 0xa4c   :  { %v1627_v46 = vadd.f32 %v1668_v44, %v1626_v45 }
 0xa4d   :  { %v2128_v43 = vpop.f32.mrf.mxu1 }
 0xa4e   :  { %1630 = vst [vmem:[#allocation11] sm:$0xff] %v1627_v46 }
 0xa4f   :  { %2229 = shalt.err (!%p2226_p10)
}
 0xa50   :  { %1640 = dma.vmem_to_hbm [thread:$0]  %s1638_s20, 128, %s2480_s5, [#allocation5]  }
 0xa51   :  { %2244 = dma.done.wait [#allocation5], 128  }
 0xa52   :  { %2245 = vsyncadd [#allocation5], 4294967168 }
 0xa53   :  { %1644 = vsyncpa [#allocation4], 1 }
 0xa54   :  { %1645 = vsyncpa [#allocation7], 1 }
 0xa55   :  { %1646 = vsyncpa [#allocation10], 1 }
 0xa56   :  { %1647 = vsyncpa [#allocation5], 1 }

</bundles_post_ra>
